<compile_context>
chip_gen: v7x
topology: tpu7x:2x2x1
jax: 0.10.0
libtpu: 0.0.40
codegen_flags: <defaults>
</compile_context>

<pallas_src>
import jax
import jax.numpy as jnp
from jax.experimental import pallas as pl
from jax.experimental.pallas import tpu as pltpu

_MIB = 1024 * 1024


def _copy_kernel(x_ref, o_ref):
    # Straight VMEM tile copy: vld/vst on full vregs when the tile is
    # (sublane, 128)-aligned.
    o_ref[...] = x_ref[...]


def _vmem_capacity_bytes():
    try:
        return int(pltpu.get_tpu_info().vmem_capacity_bytes)
    except Exception:
        return 64 * _MIB  # conservative: v7x per-TensorCore VMEM


def _choose_slab(x):
    """Flatten x to a lane-dense 2-D slab (M, N), independent of x.shape[-1].

    Picks the largest N in {8192..128} that divides x.size, preferring one
    that still leaves at least a full sublane group (8 rows) to tile over.
    Falls back to the source last dim (masked stores, still correct) if the
    total element count is not a multiple of 128.
    """
    total = x.size
    best = None
    for cand in (8192, 4096, 2048, 1024, 512, 256, 128):
        if total % cand == 0:
            if best is None:
                best = cand
            if total // cand >= 8:
                best = cand
                break
    if best is None:
        best = x.shape[-1]
    return total // best, best


def _choose_tiles(M, N, itemsize, per_buf_bytes):
    """Pick a (tm, tn) tile bounded by per_buf_bytes per VMEM buffer."""
    # dtype-native sublane tile: 8 rows (f32), 16 (bf16), 32 (int8/fp8).
    sub = max(8, 32 // max(int(itemsize), 1))

    # Lane tile: full N when a single sublane-group of rows fits the budget,
    # else a 128-multiple chunk (fat-row fallback -> 2-D grid, never a
    # full-array VMEM block).
    if N <= 128 or sub * N * itemsize <= per_buf_bytes:
        tn = N
    else:
        tn = max(128, (per_buf_bytes // (sub * itemsize)) // 128 * 128)
        tn = min(tn, (N // 128) * 128)

    # Row tile: as many sublane groups as the budget allows.
    tm = per_buf_bytes // max(1, tn * itemsize)
    tm = min(tm, M)

    # Keep >= 2 row tiles so the "parallel" row axis can shard across both
    # TensorCores on v7x (harmless on single-TC v5e/v6e).
    if M >= 2 * sub:
        half = -(-((M + 1) // 2) // sub) * sub  # ceil(M/2) rounded up to sub
        tm = min(tm, half)

    tm = (tm // sub) * sub
    if tm < sub:
        tm = min(M, sub)
    if tm > M:
        tm = M  # full-extent block is always legal
    return tm, tn


def unsqueeze_pallas(x, dim):
    """Equivalent of torch.Tensor.unsqueeze(dim), data path through Pallas."""
    ndim = x.ndim
    # torch semantics: dim may be in [-(ndim+1), ndim].
    if dim < 0:
        dim = dim + ndim + 1
    assert 0 <= dim <= ndim, f"dim {dim} out of range for ndim {ndim}"
    out_shape = x.shape[:dim] + (1,) + x.shape[dim:]

    # Degenerate shapes: unsqueeze is metadata-only, skip the copy entirely.
    if x.size == 0 or ndim == 0:
        return jnp.expand_dims(x, dim)

    M, N = _choose_slab(x)
    x2d = x.reshape(M, N)  # free metadata reshape (row-major layout unchanged)
    itemsize = x2d.dtype.itemsize

    cap = _vmem_capacity_bytes()
    # ~12 MiB/buffer on 128-MiB-VMEM chips (v5e/v6e), ~6 MiB on v7x (64 MiB/TC).
    per_buf = 12 * _MIB if cap >= 96 * _MIB else 6 * _MIB
    tm, tn = _choose_tiles(M, N, itemsize, per_buf)

    grid = (pl.cdiv(M, tm), pl.cdiv(N, tn))
    tile_bytes = tm * tn * itemsize
    # Double-buffered input + double-buffered output + headroom, within capacity.
    vmem_limit = int(min(max(4 * tile_bytes + 8 * _MIB, 32 * _MIB), (cap * 3) // 4))

    y2d = pl.pallas_call(
        _copy_kernel,
        out_shape=jax.ShapeDtypeStruct((M, N), x2d.dtype),
        grid_spec=pl.GridSpec(
            grid=grid,
            in_specs=[pl.BlockSpec((tm, tn), lambda i, j: (i, j))],
            out_specs=pl.BlockSpec((tm, tn), lambda i, j: (i, j)),
        ),
        # Donate the input HBM buffer: a pure copy needs no second M*N array.
        input_output_aliases={0: 0},
        cost_estimate=pl.CostEstimate(
            flops=0, transcendentals=0, bytes_accessed=2 * M * N * itemsize),
        compiler_params=pltpu.CompilerParams(
            dimension_semantics=("parallel", "parallel"),
            vmem_limit_bytes=vmem_limit,
        ),
    )(x2d)

    # The actual "unsqueeze": pure metadata reshape (same row-major layout).
    # TODO(synk): in a real model, fuse this copy into the neighboring
    # producer/consumer kernel so unsqueeze costs 0 bytes of HBM traffic.
    return jnp.reshape(y2d, out_shape)


if __name__ == "__main__":
    # Small shape consistent with the module; the lane-dense flattening does
    # not depend on the source last dim.
    B, C, S, D = 2, 4, 16, 16
    dim = 2  # x.unsqueeze(2): (B, C, S, D) -> (B, C, 1, S, D)

    key = jax.random.PRNGKey(0)
    x = jax.random.normal(key, (B, C, S, D), dtype=jnp.float32)

    out = unsqueeze_pallas(x, dim)
    out = jax.block_until_ready(out)
    ref = jnp.expand_dims(x, dim)
    assert out.shape == (B, C, 1, S, D), out.shape
    assert out.dtype == x.dtype
    assert jnp.array_equal(out, ref)

    # Extra coverage: negative dim + bf16 (exercises the dtype-aware sublane path).
    xb = x.astype(jnp.bfloat16)
    out2 = jax.block_until_ready(unsqueeze_pallas(xb, -1))
    assert out2.shape == (B, C, S, D, 1), out2.shape
    assert out2.dtype == xb.dtype
    assert jnp.array_equal(out2, jnp.expand_dims(xb, -1))

    print("KERNEL_OK")
</pallas_src>

<mosaic_0001>
module attributes {stable_mosaic.version = 11 : i64} {
  func.func @_copy_kernel(%arg0: i32, %arg1: i32, %arg2: memref<8x256xf32, #tpu.memory_space<vmem>>, %arg3: memref<8x256xf32, #tpu.memory_space<vmem>>) attributes {dimension_semantics = [#tpu.dimension_semantics<parallel>, #tpu.dimension_semantics<parallel>], iteration_bounds = array<i64: 1, 1>, scalar_prefetch = 0 : i64, scratch_operands = 0 : i64, tpu.core_type = #tpu.core_type<tc>, window_params = [{transform_indices = @transform_0, window_bounds = array<i64: 8, 256>}, {transform_indices = @transform_1, window_bounds = array<i64: 8, 256>}]} {
    %c0 = arith.constant 0 : index
    %c0_0 = arith.constant 0 : index
    %0 = vector.load %arg2[%c0, %c0_0] : memref<8x256xf32, #tpu.memory_space<vmem>>, vector<8x256xf32>
    %c0_1 = arith.constant 0 : index
    %c0_2 = arith.constant 0 : index
    %1 = vector.load %arg3[%c0_1, %c0_2] : memref<8x256xf32, #tpu.memory_space<vmem>>, vector<8x256xf32>
    tpu.vector_store %arg3[%c0_1, %c0_2], %0 {strides = array<i32>} : memref<8x256xf32, #tpu.memory_space<vmem>>, vector<8x256xf32>,
    return
  }
  func.func @transform_0(%arg0: i32, %arg1: i32) -> (i32, i32) {
    %c0_i32 = arith.constant 0 : i32
    return %arg0, %arg1 : i32, i32
  }
  func.func @transform_1(%arg0: i32, %arg1: i32) -> (i32, i32) {
    %c0_i32 = arith.constant 0 : i32
    return %arg0, %arg1 : i32, i32
  }
}

</mosaic_0001>

<bundles_post_ra>
// kernel: tpu_custom_call.1
= control target key start
LH: loop header
LB: loop body
LE: loop exit
PB: predicated region body
PF: predicated region fallthrough
CT: control target
= control target key end

     0   :  { %6 = vsyncpa [#allocation3], 0  ;;  %s126_s0 = inlined_call_operand.hbm [shape: f32[8,256], index: 0, kind: input, shape index: {}, may-alias: {0,1}]   ;;  %s127_s1 = inlined_call_operand.hbm [shape: f32[8,256], index: 1, kind: output, shape index: {}, may-alias: {0,1}]  }
   0x1   :  { %7 = vsyncpa [#allocation4], 0  ;;  %s90_s6 = smov [#allocation2]   ;;  %s42_s10 = scalar_lea.hbm %s126_s0, 256 }
   0x2   :  { %s14_s7 = sshll.u32 %s90_s6, 4  ;;  %p43_p0 = scmp.ne.s32.totalorder %s126_s0, %s42_s10  ;;  %s15_s7 = int_to_ptr.vmem [resolvable:$true] %s14_s7 }
   0x3   :  { %p46_p1 = scmp.lt.u32.totalorder %s42_s10, %s126_s0 }
   0x5   :  { %p48_p2 = pnand %p46_p1, %p43_p0 }
   0x7   :  { %51 = shalt.err (!%p48_p2)
}
   0x8   :  { %s52_s15 = scalar_lea.vmem %s15_s7, 256  ;;  %p57_p4 = scmp.lt.s32.totalorder %s15_s7, %s15_s7 }
   0x9   :  { %p53_p3 = scmp.ne.s32.totalorder %s15_s7, %s52_s15  ;;  %p58_p5 = scmp.lt.s32.totalorder %s52_s15, %s52_s15 }
   0xb   :  { %p59_p6 = por %p58_p5, %p57_p4 }
   0xd   :  { %p60_p7 = pnand %p59_p6, %p53_p3 }
   0xf   :  { %63 = shalt.err (!%p60_p7)
}
  0x10   :  { %17 = dma.hbm_to_vmem [thread:$0]  %s126_s0, 256, %s15_s7, [#allocation3]  }
  0x11   :  { %86 = dma.done.wait [#allocation3], 256  }
  0x12   :  { %87 = vsyncadd [#allocation3], 4294967040  ;;  %s91_s18 = smov [#allocation5]   ;;  %v21_v0 = vld [vmem:[#allocation2] sm:$0xff]  ;;  %v22_v1 = vld [vmem:[#allocation2 + $0x8] sm:$0xff] }
  0x13   :  { %s31_s19 = sshll.u32 %s91_s18, 4  ;;  %23 = vst [vmem:[#allocation5] sm:$0xff] %v21_v0  ;;  %24 = vst [vmem:[#allocation5 + $0x8] sm:$0xff] %v22_v1  ;;  %s32_s19 = int_to_ptr.vmem [resolvable:$true] %s31_s19 }
  0x14   :  { %s64_s20 = scalar_lea.vmem %s32_s19, 256  ;;  %p69_p9 = scmp.lt.s32.totalorder %s32_s19, %s32_s19 }
  0x15   :  { %p65_p8 = scmp.ne.s32.totalorder %s32_s19, %s64_s20  ;;  %p70_p10 = scmp.lt.s32.totalorder %s64_s20, %s64_s20 }
  0x17   :  { %p71_p11 = por %p70_p10, %p69_p9 }
  0x19   :  { %p72_p12 = pnand %p71_p11, %p65_p8 }
  0x1b   :  { %75 = shalt.err (!%p72_p12)
}
  0x1c   :  { %s76_s0 = scalar_lea.hbm %s127_s1, 256 }
  0x1d   :  { %p77_p13 = scmp.ne.s32.totalorder %s127_s1, %s76_s0  ;;  %p80_p0 = scmp.lt.u32.totalorder %s76_s0, %s127_s1 }
  0x1f   :  { %p82_p1 = pnand %p80_p0, %p77_p13 }
  0x21   :  { %85 = shalt.err (!%p82_p1)
}
  0x22   :  { %34 = dma.vmem_to_hbm [thread:$0]  %s32_s19, 256, %s127_s1, [#allocation4]  }
  0x23   :  { %88 = dma.done.wait [#allocation4], 256  }
  0x24   :  { %89 = vsyncadd [#allocation4], 4294967040 }
  0x25   :  { %38 = vsyncpa [#allocation3], 1 }
  0x26   :  { %39 = vsyncpa [#allocation4], 1 }

</bundles_post_ra>
